<compile_context>
chip_gen: v6e
topology: v6e:2x2x1
jax: 0.10.0
libtpu: 0.0.40
codegen_flags: <defaults>
</compile_context>

<pallas_src>
import jax
import jax.numpy as jnp
import numpy as np
from jax.experimental import pallas as pl
from jax.experimental.pallas import tpu as pltpu


def _mlp_kernel(x_ref, w1_ref, b1_ref, w2_ref, b2_ref, o_ref):
    # fc1: (TILE_N, D_in) @ (D_in, H) on the MXU with f32 accumulation.
    h = jnp.dot(x_ref[...], w1_ref[...], preferred_element_type=jnp.float32)
    # bias + ReLU on the VPU, in f32.
    h = jnp.maximum(h + b1_ref[...], 0.0)
    # fc2: (TILE_N, H) @ (H, D_out_padded), f32 accumulation.
    out = jnp.dot(h.astype(w2_ref.dtype), w2_ref[...],
                  preferred_element_type=jnp.float32)
    o_ref[...] = (out + b2_ref[...]).astype(o_ref.dtype)


def hsi_classifier_forward(x, w1, b1, w2, b2, *, tile_n=512):
    """x: (N, input_size); w1: (input_size, hidden); b1: (hidden,);
       w2: (hidden, output); b2: (output,). Returns (N, output) in float32.

    Matches nn.Linear semantics (weights stored transposed vs. PyTorch:
    out = relu(x @ W1 + b1) @ W2 + b2)."""
    n, d_in = x.shape
    hidden = w1.shape[1]
    d_out = w2.shape[1]

    # --- lane-dense output padding (3 -> 128 classes, zero columns) ---------
    d_out_p = max(128, ((d_out + 127) // 128) * 128)

    # --- choose a row tile: multiple of 16 (bf16 sublane packing), capped ---
    n16 = ((n + 15) // 16) * 16
    tile_n = max(16, min(((tile_n + 15) // 16) * 16, n16))
    n_p = pl.cdiv(n, tile_n) * tile_n          # pad N up to a whole # of tiles

    # --- wrapper-side casts / padding (cheap, outside the kernel) -----------
    x_p = jnp.pad(x, ((0, n_p - n), (0, 0))).astype(jnp.bfloat16)
    w1_b = w1.astype(jnp.bfloat16)
    w2_p = jnp.pad(w2, ((0, 0), (0, d_out_p - d_out))).astype(jnp.bfloat16)
    b1_2d = b1.reshape(1, hidden).astype(jnp.float32)
    b2_2d = jnp.pad(b2, (0, d_out_p - d_out)).reshape(1, d_out_p).astype(jnp.float32)

    grid = (n_p // tile_n,)
    out = pl.pallas_call(
        _mlp_kernel,
        out_shape=jax.ShapeDtypeStruct((n_p, d_out_p), jnp.float32),
        grid=grid,
        in_specs=[
            pl.BlockSpec((tile_n, d_in), lambda i: (i, 0)),      # x: tiled over N
            pl.BlockSpec((d_in, hidden), lambda i: (0, 0)),      # W1: resident
            pl.BlockSpec((1, hidden), lambda i: (0, 0)),         # b1: resident
            pl.BlockSpec((hidden, d_out_p), lambda i: (0, 0)),   # W2: resident
            pl.BlockSpec((1, d_out_p), lambda i: (0, 0)),        # b2: resident
        ],
        out_specs=pl.BlockSpec((tile_n, d_out_p), lambda i: (i, 0)),
        compiler_params=pltpu.CompilerParams(
            dimension_semantics=("parallel",)),                  # megacore on v7x
    )(x_p, w1_b, b1_2d, w2_p, b2_2d)

    # Strip the row padding and the padded class columns.
    return out[:n, :d_out]


def _linear_init(key, fan_in, fan_out, dtype=jnp.float32):
    # Deterministic, PyTorch-nn.Linear-like uniform init U(-1/sqrt(fan_in), +).
    kw, kb = jax.random.split(key)
    bound = 1.0 / np.sqrt(fan_in)
    w = jax.random.uniform(kw, (fan_in, fan_out), dtype, -bound, bound)
    b = jax.random.uniform(kb, (fan_out,), dtype, -bound, bound)
    return w, b


if __name__ == "__main__":
    # Small shapes consistent with the module: N pixels, input_size spectral
    # bands, hidden_size=128 (as in the reference), output_size=3 classes.
    N, INPUT_SIZE, HIDDEN_SIZE, OUTPUT_SIZE = 64, 32, 128, 3

    key = jax.random.PRNGKey(0)
    kx, k1, k2 = jax.random.split(key, 3)

    x = jax.random.normal(kx, (N, INPUT_SIZE), jnp.float32)
    w1, b1 = _linear_init(k1, INPUT_SIZE, HIDDEN_SIZE)
    w2, b2 = _linear_init(k2, HIDDEN_SIZE, OUTPUT_SIZE)

    out = hsi_classifier_forward(x, w1, b1, w2, b2)
    out = jax.block_until_ready(out)

    # Reference with the same bf16 input/weight casts and f32 accumulation.
    h_ref = jnp.dot(x.astype(jnp.bfloat16), w1.astype(jnp.bfloat16),
                    preferred_element_type=jnp.float32) + b1
    h_ref = jnp.maximum(h_ref, 0.0).astype(jnp.bfloat16)
    ref_bf16 = jnp.dot(h_ref, w2.astype(jnp.bfloat16),
                       preferred_element_type=jnp.float32) + b2
    np.testing.assert_allclose(np.asarray(out), np.asarray(ref_bf16),
                               rtol=1e-3, atol=1e-3)

    # Sanity check against the full-f32 reference (looser, bf16 drift).
    ref_f32 = jnp.maximum(x @ w1 + b1, 0.0) @ w2 + b2
    np.testing.assert_allclose(np.asarray(out), np.asarray(ref_f32),
                               rtol=5e-2, atol=5e-2)

    print("KERNEL_OK")
</pallas_src>

<mosaic_0001>
module attributes {stable_mosaic.version = 11 : i64} {
  func.func @_mlp_kernel(%arg0: i32, %arg1: memref<64x32xbf16, #tpu.memory_space<vmem>>, %arg2: memref<32x128xbf16, #tpu.memory_space<vmem>>, %arg3: memref<1x128xf32, #tpu.memory_space<vmem>>, %arg4: memref<128x128xbf16, #tpu.memory_space<vmem>>, %arg5: memref<1x128xf32, #tpu.memory_space<vmem>>, %arg6: memref<64x128xf32, #tpu.memory_space<vmem>>) attributes {dimension_semantics = [#tpu.dimension_semantics<parallel>], iteration_bounds = array<i64: 1>, scalar_prefetch = 0 : i64, scratch_operands = 0 : i64, tpu.core_type = #tpu.core_type<tc>, window_params = [{transform_indices = @transform_0, window_bounds = array<i64: 64, 32>}, {pipeline_mode = #tpu.pipeline_mode<synchronous>, transform_indices = @transform_1, window_bounds = array<i64: 32, 128>}, {pipeline_mode = #tpu.pipeline_mode<synchronous>, transform_indices = @transform_2, window_bounds = array<i64: 1, 128>}, {pipeline_mode = #tpu.pipeline_mode<synchronous>, transform_indices = @transform_3, window_bounds = array<i64: 128, 128>}, {pipeline_mode = #tpu.pipeline_mode<synchronous>, transform_indices = @transform_4, window_bounds = array<i64: 1, 128>}, {transform_indices = @transform_5, window_bounds = array<i64: 64, 128>}]} {
    %c0 = arith.constant 0 : index
    %c0_0 = arith.constant 0 : index
    %0 = vector.load %arg1[%c0, %c0_0] : memref<64x32xbf16, #tpu.memory_space<vmem>>, vector<64x32xbf16>
    %c0_1 = arith.constant 0 : index
    %c0_2 = arith.constant 0 : index
    %1 = vector.load %arg2[%c0_1, %c0_2] : memref<32x128xbf16, #tpu.memory_space<vmem>>, vector<32x128xbf16>
    %cst = arith.constant dense<0.000000e+00> : vector<64x128xf32>
    %2 = tpu.matmul %0, %1, %cst {dimension_numbers = #tpu.dot_dimension_numbers<[1], [0], [0], [1], [0, 0, 1, 1], [], []>} : vector<64x32xbf16>, vector<32x128xbf16>, vector<64x128xf32> -> vector<64x128xf32>
    %c0_3 = arith.constant 0 : index
    %c0_4 = arith.constant 0 : index
    %3 = vector.load %arg3[%c0_3, %c0_4] : memref<1x128xf32, #tpu.memory_space<vmem>>, vector<1x128xf32>
    %4 = vector.broadcast %3 : vector<1x128xf32> to vector<64x128xf32>
    %5 = arith.addf %2, %4 : vector<64x128xf32>
    %cst_5 = arith.constant 0.000000e+00 : f32
    %6 = vector.broadcast %cst_5 : f32 to vector<64x128xf32>
    %7 = arith.maximumf %5, %6 : vector<64x128xf32>
    %8 = arith.truncf %7 : vector<64x128xf32> to vector<64x128xbf16>
    %c0_6 = arith.constant 0 : index
    %c0_7 = arith.constant 0 : index
    %9 = vector.load %arg4[%c0_6, %c0_7] : memref<128x128xbf16, #tpu.memory_space<vmem>>, vector<128x128xbf16>
    %cst_8 = arith.constant dense<0.000000e+00> : vector<64x128xf32>
    %10 = tpu.matmul %8, %9, %cst_8 {dimension_numbers = #tpu.dot_dimension_numbers<[1], [0], [0], [1], [0, 0, 1, 1], [], []>} : vector<64x128xbf16>, vector<128x128xbf16>, vector<64x128xf32> -> vector<64x128xf32>
    %c0_9 = arith.constant 0 : index
    %c0_10 = arith.constant 0 : index
    %11 = vector.load %arg5[%c0_9, %c0_10] : memref<1x128xf32, #tpu.memory_space<vmem>>, vector<1x128xf32>
    %12 = vector.broadcast %11 : vector<1x128xf32> to vector<64x128xf32>
    %13 = arith.addf %10, %12 : vector<64x128xf32>
    %c0_11 = arith.constant 0 : index
    %c0_12 = arith.constant 0 : index
    %14 = vector.load %arg6[%c0_11, %c0_12] : memref<64x128xf32, #tpu.memory_space<vmem>>, vector<64x128xf32>
    tpu.vector_store %arg6[%c0_11, %c0_12], %13 {strides = array<i32>} : memref<64x128xf32, #tpu.memory_space<vmem>>, vector<64x128xf32>,
    return
  }
  func.func @transform_0(%arg0: i32) -> (i32, i32) {
    %c0_i32 = arith.constant 0 : i32
    %c0_i32_0 = arith.constant 0 : i32
    return %arg0, %c0_i32 : i32, i32
  }
  func.func @transform_1(%arg0: i32) -> (i32, i32) {
    %c0_i32 = arith.constant 0 : i32
    %c0_i32_0 = arith.constant 0 : i32
    %c0_i32_1 = arith.constant 0 : i32
    return %c0_i32, %c0_i32_0 : i32, i32
  }
  func.func @transform_2(%arg0: i32) -> (i32, i32) {
    %c0_i32 = arith.constant 0 : i32
    %c0_i32_0 = arith.constant 0 : i32
    %c0_i32_1 = arith.constant 0 : i32
    return %c0_i32, %c0_i32_0 : i32, i32
  }
  func.func @transform_3(%arg0: i32) -> (i32, i32) {
    %c0_i32 = arith.constant 0 : i32
    %c0_i32_0 = arith.constant 0 : i32
    %c0_i32_1 = arith.constant 0 : i32
    return %c0_i32, %c0_i32_0 : i32, i32
  }
  func.func @transform_4(%arg0: i32) -> (i32, i32) {
    %c0_i32 = arith.constant 0 : i32
    %c0_i32_0 = arith.constant 0 : i32
    %c0_i32_1 = arith.constant 0 : i32
    return %c0_i32, %c0_i32_0 : i32, i32
  }
  func.func @transform_5(%arg0: i32) -> (i32, i32) {
    %c0_i32 = arith.constant 0 : i32
    %c0_i32_0 = arith.constant 0 : i32
    return %arg0, %c0_i32 : i32, i32
  }
}

</mosaic_0001>

<bundles_post_ra>
// kernel: tpu_custom_call.1
= control target key start
LH: loop header
LB: loop body
LE: loop exit
PB: predicated region body
PF: predicated region fallthrough
CT: control target
= control target key end

     0   :  { %10 = vsyncpa [#allocation3], 0  ;;  %s546_s0 = inlined_call_operand.vmem [shape: bf16[64,32], index: 0, kind: input, shape index: {}]   ;;  %s547_s1 = inlined_call_operand.vmem [shape: bf16[32,128], index: 1, kind: input, shape index: {}]   ;;  %s548_s2 = inlined_call_operand.vmem [shape: f32[1,128], index: 2, kind: input, shape index: {}]   ;;  %s549_s3 = inlined_call_operand.hbm [shape: bf16[128,128], index: 3, kind: input, shape index: {}]   ;;  %s550_s4 = inlined_call_operand.vmem [shape: f32[1,128], index: 4, kind: input, shape index: {}]   ;;  %s551_s5 = inlined_call_operand.hbm [shape: f32[64,128], index: 5, kind: output, shape index: {}]  }
   0x1   :  { %11 = vsyncpa [#allocation4], 0  ;;  %s476_s18 = smov [#allocation2]  }
   0x2   :  { %s23_s19 = sshll.u32 %s476_s18, 4  ;;  %s24_s19 = int_to_ptr.vmem [resolvable:$true] %s23_s19 }
   0x3   :  { %s440_s20 = scalar_lea.vmem %s24_s19, 1024  ;;  %p445_p1 = scmp.lt.s32.totalorder %s24_s19, %s24_s19 }
   0x4   :  { %p441_p0 = scmp.ne.s32.totalorder %s24_s19, %s440_s20  ;;  %p446_p2 = scmp.lt.s32.totalorder %s440_s20, %s440_s20 }
   0x6   :  { %p447_p3 = por %p446_p2, %p445_p1 }
   0x8   :  { %p448_p4 = pnand %p447_p3, %p441_p0 }
   0xa   :  { %451 = shalt.err (!%p448_p4)
}
   0xb   :  { %s477_s21 = smov 64   ;;  %s478_s22 = smov 4  }
   0xc   :  { %29 = dma.hbm_to_vmem [thread:$0]  %s549_s3, 1024, %s24_s19, [#allocation3], %s477_s21, %s477_s21, %s478_s22  }
   0xd   :  { %472 = dma.done.wait [#allocation3], 1024  }
   0xe   :  { %473 = vsyncadd [#allocation3], 4294966272  ;;  %v418_v0 = vld [vmem:[%s547_s1 + $0x8] sm:$0xff]   ;;  %v419_v1 = vld [vmem:[%s547_s1] sm:$0xff]   ;;  %vm87_vm0 = vcmask 261120   ;;  %s479_s12 = smov [#allocation5]  }
   0xf   :  { %376 = vmatprep.subr.bf16.mxu0 %v418_v0  ;;  %v420_v2 = vld [vmem:[%s546_s0] sm:$0xff]   ;;  %v421_v3 = vld [vmem:[%s546_s0 + $0x8] sm:$0xff]   ;;  %v422_v4 = vld [vmem:[%s546_s0 + $0x10] sm:$0xff]   ;;  %s326_s13 = sshll.u32 %s479_s12, 4  ;;  %s327_s13 = int_to_ptr.vmem [resolvable:$true] %s326_s13 }
  0x10   :  { %377 = vmatpush3.bf16.msra.mxu0 %v418_v0  ;;  %380 = vmatprep.mubr.msk.bf16.mxu0 %vm87_vm0, %v420_v2  ;;  %v424_v5 = vld [vmem:[#allocation2 + $0x38] sm:$0xff]   ;;  %v425_v6 = vld [vmem:[#allocation2 + $0x30] sm:$0xff]   ;;  %v426_v7 = vld [vmem:[#allocation2 + $0x28] sm:$0xff]   ;;  %p457_p6 = scmp.lt.s32.totalorder %s327_s13, %s327_s13 }
  0x11   :  { %378 = vmatprep.subr.bf16.mxu0 %v419_v1  ;;  %388 = vmatprep.subr.bf16.mxu1 %v424_v5  ;;  %v423_v8 = vld [vmem:[%s546_s0 + $0x18] sm:$0xff]   ;;  %v427_v9 = vld [vmem:[#allocation2 + $0x20] sm:$0xff]   ;;  %v429_v11 = vld [vmem:[#allocation2 + $0x10] sm:$0xff]  }
  0x12   :  { %389 = vmatpush3.bf16.msra.mxu1 %v424_v5  ;;  %v428_v10 = vld [vmem:[#allocation2 + $0x18] sm:$0xff]   ;;  %v430_v12 = vld [vmem:[#allocation2 + $0x8] sm:$0xff]   ;;  %v431_v13 = vld [vmem:[#allocation2] sm:$0xff]  }
  0x13   :  { %390 = vmatprep.subr.bf16.mxu1 %v425_v6  ;;  %v338_v16 = vld [vmem:[%s548_s2] ss:$0 sm:$0xff] }
  0x14   :  { %379 = vmatpush3.bf16.msra.mxu0 %v419_v1  ;;  %v349_v43 = vld [vmem:[%s550_s4] ss:$0 sm:$0xff]  ;;  %s452_s4 = scalar_lea.vmem %s327_s13, 1024 }
  0x15   :  { %p453_p5 = scmp.ne.s32.totalorder %s327_s13, %s452_s4  ;;  %p458_p7 = scmp.lt.s32.totalorder %s452_s4, %s452_s4 }
  0x16   :  { %391 = vmatpush3.bf16.msra.mxu1 %v425_v6 }
  0x17   :  { %381 = vmatmul.mubr.msk.bf16.vlgmr.msra.gmra.mxu0 %vm87_vm0, %v421_v3  ;;  %392 = vmatprep.subr.bf16.mxu1 %v426_v7  ;;  %p459_p8 = por %p458_p7, %p457_p6 }
  0x18   :  { %384 = vmatprep.mubr.msk.bf16.mxu0 %vm87_vm0, %v422_v4 }
  0x19   :  { %p460_p9 = pnand %p459_p8, %p453_p5 }
  0x1a   :  { %393 = vmatpush3.bf16.msra.mxu1 %v426_v7 }
  0x1b   :  { %394 = vmatprep.subr.bf16.mxu1 %v427_v9 }
  0x1e   :  { %395 = vmatpush3.bf16.msra.mxu1 %v427_v9 }
  0x1f   :  { %385 = vmatmul.mubr.msk.bf16.gmra.mxu0 %vm87_vm0, %v423_v8  ;;  %396 = vmatprep.subr.bf16.mxu1 %v428_v10 }
  0x22   :  { %397 = vmatpush3.bf16.msra.mxu1 %v428_v10 }
  0x23   :  { %398 = vmatprep.subr.bf16.mxu1 %v429_v11 }
  0x26   :  { %399 = vmatpush3.bf16.msra.mxu1 %v429_v11 }
  0x27   :  { %400 = vmatprep.subr.bf16.mxu1 %v430_v12 }
  0x2a   :  { %401 = vmatpush3.bf16.msra.mxu1 %v430_v12 }
  0x2b   :  { %402 = vmatprep.subr.bf16.mxu1 %v431_v13 }
  0x2e   :  { %403 = vmatpush3.bf16.msra.mxu1 %v431_v13 }
  0xd7   :  { %v382_v14 = vpop.f32.mrf.mxu0 }
  0xd8   :  { %v143_v20 = vadd.f32 %v382_v14, %v338_v16 }
  0xd9   :  { %v134_v15 = vpop.f32.mrf.mxu0 }
  0xda   :  { %v135_v18 = vadd.f32 %v338_v16, %v134_v15  ;;  %v167_v27 = vmax.f32 %v143_v20, 0.0 }
  0xdb   :  { %v383_v17 = vpop.f32.mrf.mxu0 }
  0xdc   :  { %v146_v19 = vadd.f32 %v383_v17, %v338_v16  ;;  %v165_v25 = vmax.f32 %v135_v18, 0.0 }
  0xdd   :  { %v137_v21 = vpop.f32.mrf.mxu0 }
  0xde   :  { %v138_v22 = vadd.f32 %v338_v16, %v137_v21  ;;  %v168_v23 = vmax.f32 %v146_v19, 0.0 }
  0xdf   :  { %v386_v24 = vpop.f32.mrf.mxu0 }
  0xe0   :  { %v166_v26 = vmax.f32 %v138_v22, 0.0  ;;  %v174_v30 = vpack.c.bf16 %v168_v23, %v167_v27  ;;  %v159_v34 = vadd.f32 %v386_v24, %v338_v16 }
  0xe1   :  { %v150_v28 = vpop.f32.mrf.mxu0 }
  0xe2   :  { %v173_v29 = vpack.c.bf16 %v166_v26, %v165_v25  ;;  %v151_v32 = vadd.f32 %v338_v16, %v150_v28  ;;  %v171_v40 = vmax.f32 %v159_v34, 0.0 }
  0xe3   :  { %v387_v31 = vpop.f32.mrf.mxu0 }
  0xe4   :  { %v162_v33 = vadd.f32 %v387_v31, %v338_v16  ;;  %404 = vmatprep.mubr.bf16.mxu1 %v173_v29  ;;  %v169_v38 = vmax.f32 %v151_v32, 0.0 }
  0xe5   :  { %v153_v35 = vpop.f32.mrf.mxu0  ;;  %405 = vmatmul.mubr.bf16.vlgmr.msra.gmra.mxu1 %v174_v30 }
  0xe6   :  { %v154_v36 = vadd.f32 %v338_v16, %v153_v35  ;;  %v172_v37 = vmax.f32 %v162_v33, 0.0 }
  0xe8   :  { %v170_v39 = vmax.f32 %v154_v36, 0.0  ;;  %v176_v42 = vpack.c.bf16 %v172_v37, %v171_v40 }
  0xea   :  { %v175_v41 = vpack.c.bf16 %v170_v39, %v169_v38 }
  0xec   :  { %408 = vmatprep.mubr.bf16.mxu1 %v175_v41 }
  0xed   :  { %409 = vmatmul.mubr.bf16.gmra.mxu1 %v176_v42 }
 0x1a5   :  { %v406_v44 = vpop.f32.mrf.mxu1 }
 0x1a6   :  { %v291_v45 = vadd.f32 %v406_v44, %v349_v43 }
 0x1a7   :  { %v282_v46 = vpop.f32.mrf.mxu1 }
 0x1a8   :  { %315 = vst [vmem:[#allocation5 + $0x10] sm:$0xff] %v291_v45  ;;  %v283_v47 = vadd.f32 %v349_v43, %v282_v46 }
 0x1a9   :  { %v407_v48 = vpop.f32.mrf.mxu1 }
 0x1aa   :  { %313 = vst [vmem:[#allocation5] sm:$0xff] %v283_v47  ;;  %v294_v49 = vadd.f32 %v407_v48, %v349_v43 }
 0x1ab   :  { %v285_v50 = vpop.f32.mrf.mxu1 }
 0x1ac   :  { %316 = vst [vmem:[#allocation5 + $0x18] sm:$0xff] %v294_v49  ;;  %v286_v51 = vadd.f32 %v349_v43, %v285_v50 }
 0x1ad   :  { %v410_v52 = vpop.f32.mrf.mxu1 }
 0x1ae   :  { %314 = vst [vmem:[#allocation5 + $0x8] sm:$0xff] %v286_v51  ;;  %v307_v53 = vadd.f32 %v410_v52, %v349_v43 }
 0x1af   :  { %v298_v54 = vpop.f32.mrf.mxu1 }
 0x1b0   :  { %319 = vst [vmem:[#allocation5 + $0x30] sm:$0xff] %v307_v53  ;;  %v299_v55 = vadd.f32 %v349_v43, %v298_v54 }
 0x1b1   :  { %v411_v56 = vpop.f32.mrf.mxu1 }
 0x1b2   :  { %317 = vst [vmem:[#allocation5 + $0x20] sm:$0xff] %v299_v55  ;;  %v310_v57 = vadd.f32 %v411_v56, %v349_v43 }
 0x1b3   :  { %v301_v58 = vpop.f32.mrf.mxu1 }
 0x1b4   :  { %320 = vst [vmem:[#allocation5 + $0x38] sm:$0xff] %v310_v57  ;;  %v302_v59 = vadd.f32 %v349_v43, %v301_v58 }
 0x1b6   :  { %318 = vst [vmem:[#allocation5 + $0x28] sm:$0xff] %v302_v59 }
 0x1b7   :  { %463 = shalt.err (!%p460_p9)
}
 0x1b8   :  { %s480_s14 = smov 128   ;;  %s481_s15 = smov 8  }
 0x1b9   :  { %332 = dma.vmem_to_hbm [thread:$0]  %s327_s13, 1024, %s551_s5, [#allocation4], %s480_s14, %s480_s14, %s481_s15  }
 0x1ba   :  { %474 = dma.done.wait [#allocation4], 1024  }
 0x1bb   :  { %475 = vsyncadd [#allocation4], 4294966272 }
 0x1bc   :  { %336 = vsyncpa [#allocation3], 1 }
 0x1bd   :  { %337 = vsyncpa [#allocation4], 1 }

</bundles_post_ra>
